<compile_context>
chip_gen: v5e
topology: v5e:2x2
jax: 0.10.0
libtpu: 0.0.40
codegen_flags: <defaults>
</compile_context>

<pallas_src>
import jax
import jax.numpy as jnp
from jax.experimental import pallas as pl
from jax.experimental.pallas import tpu as pltpu


def _round_up(n, m):
    return ((n + m - 1) // m) * m


def rbf_kernel(x_ref, ct_ref, xsq_ref, col_ref, o_ref):
    # x_ref:   (tm, D)    input tile                                (mxu dtype)
    # ct_ref:  (D, tO)    centres^T, pre-scaled by 2*exp(-2*ls)     (mxu dtype)
    # xsq_ref: (tm, 1)    precomputed ||x||^2                       (f32)
    # col_ref: (2, tO)    row0 = exp(-2*ls), row1 = ||c||^2*exp(-2*ls)  (f32)
    # o_ref:   (tm, tO)   output tile (lane-dense, tO % 128 == 0)
    xc = jnp.dot(x_ref[...], ct_ref[...],
                 preferred_element_type=jnp.float32)        # MXU: 2*x.c*inv2
    col = col_ref[...]
    inv2 = col[0:1, :]                                       # (1, tO)
    csq = col[1:2, :]                                        # (1, tO)
    expo = xc - xsq_ref[...] * inv2 - csq                    # = -(dist/sigma)^2
    o_ref[...] = jnp.exp(jnp.minimum(expo, 0.0)).astype(o_ref.dtype)


def rbf_forward(x, centres, log_sigmas, *, tm=512, to=256,
                mxu_dtype=jnp.bfloat16, out_dtype=jnp.float32):
    N, D = x.shape
    O, D2 = centres.shape
    assert D == D2

    x = x.astype(jnp.float32)
    centres = centres.astype(jnp.float32)
    log_sigmas = log_sigmas.astype(jnp.float32)

    n_min = _round_up(N, 8)
    o_min = _round_up(O, 128)
    tm_eff = min(tm, n_min)
    to_eff = min(to, o_min)

    mxu_bytes = jnp.dtype(mxu_dtype).itemsize
    out_bytes = jnp.dtype(out_dtype).itemsize

    def footprint(tm_, to_):
        per_step = (tm_ * D * mxu_bytes         # x tile
                    + D * to_ * mxu_bytes       # centres^T tile
                    + tm_ * 128 * 4             # ||x||^2 (lane-padded)
                    + 8 * to_ * 4               # column constants (sublane-padded)
                    + tm_ * to_ * out_bytes)    # output tile
        return 2 * per_step                     # double-buffered

    # Shrink tiles if full-D operand tiles would exceed a safe VMEM budget (v7x).
    budget = 24 * 1024 * 1024
    while footprint(tm_eff, to_eff) > budget and tm_eff > 128:
        tm_eff = max(128, tm_eff // 2)
    while footprint(tm_eff, to_eff) > budget and to_eff > 128:
        to_eff = max(128, to_eff // 2)

    # Avoid a (1, 1) grid when the batch can be split (keeps both v7x TCs busy).
    if n_min <= tm_eff and o_min <= to_eff and n_min >= 16:
        tm_eff = _round_up(-(-n_min // 2), 8)

    n_pad = _round_up(N, tm_eff)
    o_pad = _round_up(O, to_eff)

    if n_pad != N:          # no tail rows silently dropped
        x = jnp.pad(x, ((0, n_pad - N), (0, 0)))
    if o_pad != O:          # lane-dense output stores
        centres = jnp.pad(centres, ((0, o_pad - O), (0, 0)))
        log_sigmas = jnp.pad(log_sigmas, (0, o_pad - O))

    # Loop-invariant work hoisted out of the kernel entirely.
    inv2 = jnp.exp(-2.0 * log_sigmas)                               # (o_pad,)
    csq_scaled = jnp.sum(centres * centres, axis=-1) * inv2         # (o_pad,)
    col_consts = jnp.stack([inv2, csq_scaled], axis=0)              # (2, o_pad) f32
    x_sq = jnp.sum(x * x, axis=-1, keepdims=True)                   # (n_pad, 1) f32
    ct_scaled = (centres * (2.0 * inv2)[:, None]).T.astype(mxu_dtype)  # (D, o_pad)
    x_mxu = x.astype(mxu_dtype)

    grid = (n_pad // tm_eff, o_pad // to_eff)
    vmem_limit = int(min(max(2 * footprint(tm_eff, to_eff) + (8 << 20), 32 << 20),
                         56 << 20))

    out = pl.pallas_call(
        rbf_kernel,
        out_shape=jax.ShapeDtypeStruct((n_pad, o_pad), out_dtype),
        grid_spec=pl.GridSpec(
            grid=grid,
            in_specs=[
                pl.BlockSpec((tm_eff, D), lambda i, j: (i, 0)),     # x tile
                pl.BlockSpec((D, to_eff), lambda i, j: (0, j)),     # centres^T tile
                pl.BlockSpec((tm_eff, 1), lambda i, j: (i, 0)),     # ||x||^2
                pl.BlockSpec((2, to_eff), lambda i, j: (0, j)),     # column constants
            ],
            out_specs=pl.BlockSpec((tm_eff, to_eff), lambda i, j: (i, j)),
        ),
        compiler_params=pltpu.CompilerParams(
            dimension_semantics=("parallel", "parallel"),
            vmem_limit_bytes=vmem_limit,
        ),
    )(x_mxu, ct_scaled, x_sq, col_consts)

    return out[:N, :O]


def rbf_reference(x, centres, log_sigmas):
    # Pure-JAX reference matching the PyTorch forward exactly (gaussian basis).
    diff = x[:, None, :] - centres[None, :, :]
    dist = jnp.sqrt(jnp.sum(diff * diff, axis=-1)) / jnp.exp(log_sigmas)[None, :]
    return jnp.exp(-(dist * dist))


if __name__ == "__main__":
    key = jax.random.PRNGKey(0)
    k_x, k_c, k_x2, k_c2 = jax.random.split(key, 4)

    # Case 1: intended-use shapes, f32 MXU path -> tight tolerance.
    N, in_features, out_features = 16, 32, 16
    x = jax.random.normal(k_x, (N, in_features), dtype=jnp.float32)
    centres = jax.random.normal(k_c, (out_features, in_features), dtype=jnp.float32)
    log_sigmas = jnp.zeros((out_features,), dtype=jnp.float32)

    out = jax.block_until_ready(
        rbf_forward(x, centres, log_sigmas, mxu_dtype=jnp.float32))
    ref = rbf_reference(x, centres, log_sigmas)
    assert out.shape == (N, out_features)
    assert jnp.allclose(out, ref, atol=3e-5, rtol=1e-4), "mismatch vs reference (f32 path)"

    # Case 2: same shapes, default bf16 MXU operands -> looser tolerance.
    out_bf = jax.block_until_ready(rbf_forward(x, centres, log_sigmas))
    assert out_bf.shape == (N, out_features)
    assert jnp.allclose(out_bf, ref, atol=8e-2, rtol=0.0), "mismatch vs reference (bf16 path)"

    # Case 3: non-divisible shapes to exercise padding / tail handling (f32).
    N2, O2 = 13, 10
    x2 = jax.random.normal(k_x2, (N2, in_features), dtype=jnp.float32)
    centres2 = jax.random.normal(k_c2, (O2, in_features), dtype=jnp.float32)
    log_sigmas2 = jnp.zeros((O2,), dtype=jnp.float32)

    out2 = jax.block_until_ready(
        rbf_forward(x2, centres2, log_sigmas2, mxu_dtype=jnp.float32))
    ref2 = rbf_reference(x2, centres2, log_sigmas2)
    assert out2.shape == (N2, O2)
    assert jnp.allclose(out2, ref2, atol=3e-5, rtol=1e-4), "mismatch vs reference (padding)"

    print("KERNEL_OK")
</pallas_src>

<mosaic_0001>
module attributes {stable_mosaic.version = 11 : i64} {
  func.func @rbf_kernel(%arg0: i32, %arg1: i32, %arg2: memref<8x32xf32, #tpu.memory_space<vmem>>, %arg3: memref<32x128xf32, #tpu.memory_space<vmem>>, %arg4: memref<8x1xf32, #tpu.memory_space<vmem>>, %arg5: memref<2x128xf32, #tpu.memory_space<vmem>>, %arg6: memref<8x128xf32, #tpu.memory_space<vmem>>) attributes {dimension_semantics = [#tpu.dimension_semantics<parallel>, #tpu.dimension_semantics<parallel>], iteration_bounds = array<i64: 2, 1>, scalar_prefetch = 0 : i64, scratch_operands = 0 : i64, tpu.core_type = #tpu.core_type<tc>, window_params = [{transform_indices = @transform_0, window_bounds = array<i64: 8, 32>}, {transform_indices = @transform_1, window_bounds = array<i64: 32, 128>}, {transform_indices = @transform_2, window_bounds = array<i64: 8, 1>}, {transform_indices = @transform_3, window_bounds = array<i64: 2, 128>}, {transform_indices = @transform_4, window_bounds = array<i64: 8, 128>}]} {
    %c0 = arith.constant 0 : index
    %c0_0 = arith.constant 0 : index
    %0 = vector.load %arg2[%c0, %c0_0] : memref<8x32xf32, #tpu.memory_space<vmem>>, vector<8x32xf32>
    %c0_1 = arith.constant 0 : index
    %c0_2 = arith.constant 0 : index
    %1 = vector.load %arg3[%c0_1, %c0_2] : memref<32x128xf32, #tpu.memory_space<vmem>>, vector<32x128xf32>
    %cst = arith.constant dense<0.000000e+00> : vector<8x128xf32>
    %2 = tpu.matmul %0, %1, %cst {dimension_numbers = #tpu.dot_dimension_numbers<[1], [0], [0], [1], [0, 0, 1, 1], [], []>} : vector<8x32xf32>, vector<32x128xf32>, vector<8x128xf32> -> vector<8x128xf32>
    %c0_3 = arith.constant 0 : index
    %c0_4 = arith.constant 0 : index
    %3 = vector.load %arg5[%c0_3, %c0_4] : memref<2x128xf32, #tpu.memory_space<vmem>>, vector<2x128xf32>
    %4 = vector.extract_strided_slice %3 {offsets = [0, 0], sizes = [1, 128], strides = [1, 1]} : vector<2x128xf32> to vector<1x128xf32>
    %5 = vector.extract_strided_slice %3 {offsets = [1, 0], sizes = [1, 128], strides = [1, 1]} : vector<2x128xf32> to vector<1x128xf32>
    %c0_5 = arith.constant 0 : index
    %c0_6 = arith.constant 0 : index
    %6 = vector.load %arg4[%c0_5, %c0_6] : memref<8x1xf32, #tpu.memory_space<vmem>>, vector<8x1xf32>
    %7 = vector.broadcast %6 : vector<8x1xf32> to vector<8x128xf32>
    %8 = vector.broadcast %4 : vector<1x128xf32> to vector<8x128xf32>
    %9 = arith.mulf %7, %8 : vector<8x128xf32>
    %10 = arith.subf %2, %9 : vector<8x128xf32>
    %11 = vector.broadcast %5 : vector<1x128xf32> to vector<8x128xf32>
    %12 = arith.subf %10, %11 : vector<8x128xf32>
    %cst_7 = arith.constant 0.000000e+00 : f32
    %13 = vector.broadcast %cst_7 : f32 to vector<8x128xf32>
    %14 = arith.minimumf %12, %13 : vector<8x128xf32>
    %15 = math.exp %14 : vector<8x128xf32>
    %c0_8 = arith.constant 0 : index
    %c0_9 = arith.constant 0 : index
    %16 = vector.load %arg6[%c0_8, %c0_9] : memref<8x128xf32, #tpu.memory_space<vmem>>, vector<8x128xf32>
    tpu.vector_store %arg6[%c0_8, %c0_9], %15 {strides = array<i32>} : memref<8x128xf32, #tpu.memory_space<vmem>>, vector<8x128xf32>,
    return
  }
  func.func @transform_0(%arg0: i32, %arg1: i32) -> (i32, i32) {
    %c0_i32 = arith.constant 0 : i32
    %c0_i32_0 = arith.constant 0 : i32
    return %arg0, %c0_i32 : i32, i32
  }
  func.func @transform_1(%arg0: i32, %arg1: i32) -> (i32, i32) {
    %c0_i32 = arith.constant 0 : i32
    %c0_i32_0 = arith.constant 0 : i32
    return %c0_i32, %arg1 : i32, i32
  }
  func.func @transform_2(%arg0: i32, %arg1: i32) -> (i32, i32) {
    %c0_i32 = arith.constant 0 : i32
    %c0_i32_0 = arith.constant 0 : i32
    return %arg0, %c0_i32 : i32, i32
  }
  func.func @transform_3(%arg0: i32, %arg1: i32) -> (i32, i32) {
    %c0_i32 = arith.constant 0 : i32
    %c0_i32_0 = arith.constant 0 : i32
    return %c0_i32, %arg1 : i32, i32
  }
  func.func @transform_4(%arg0: i32, %arg1: i32) -> (i32, i32) {
    %c0_i32 = arith.constant 0 : i32
    return %arg0, %arg1 : i32, i32
  }
}

</mosaic_0001>

<bundles_post_ra>
// kernel: tpu_custom_call.1
= control target key start
LH: loop header
LB: loop body
LE: loop exit
PB: predicated region body
PF: predicated region fallthrough
CT: control target
= control target key end

     0   :  { %9 = vsyncpa [#allocation3], 0  ;;  %s843_s0 = inlined_call_operand.vmem [shape: f32[16,32], index: 0, kind: input, shape index: {}]   ;;  %s844_s1 = inlined_call_operand.hbm [shape: f32[32,128], index: 1, kind: input, shape index: {}]   ;;  %s845_s2 = inlined_call_operand.vmem [shape: f32[16,1], index: 2, kind: input, shape index: {}]   ;;  %s846_s3 = inlined_call_operand.hbm [shape: f32[2,128], index: 3, kind: input, shape index: {}]   ;;  %s847_s4 = inlined_call_operand.hbm [shape: f32[16,128], index: 4, kind: output, shape index: {}]  }
   0x1   :  { %10 = vsyncpa [#allocation6], 0 }
   0x2   :  { %11 = vsyncpa [#allocation4], 0 }
   0x3   :  { %13 = vsyncpa [#allocation4 + $0x1], 0  ;;  %s715_s15 = smov 0   ;;  %s717_s16 = smov 0  }
   0x4   :  { %s719_s17 = smov 0   ;;  %s721_s18 = smov 0  }
   0x5   :  { %s723_s19 = smov 0   ;;  %s725_s20 = smov 0  }
   0x6 LB: > { %s438_s21 = sadd.s32 4294967295, %s683_s20   ;;  %s439_s22 = sadd.s32 4294967294, %s683_s20   ;;  %s683_s20 = sphi %s725_s20, %s19_s20   ;;  %s679_s19 = sphi %s723_s19, %s856_s19   ;;  %s675_s18 = sphi %s721_s18, %s855_s18   ;;  %s671_s17 = sphi %s719_s17, %s854_s17   ;;  %s667_s16 = sphi %s717_s16, %s853_s16   ;;  %s663_s15 = sphi %s715_s15, %s852_s15  }
   0x7   : > { %s31_s23 = sadd.s32 1, %s679_s19  ;;  %s144_s24 = sadd.s32 1, %s671_s17 }
   0x8   : > { %p33_p0 = scmp.ge.s32.totalorder %s31_s23, 2  ;;  %p154_p1 = scmp.ne.s32.totalorder %s671_s17, %s667_s16 }
   0x9   : > { %p155_p2 = scmp.eq.s32.totalorder %s438_s21, 1  ;;  %p160_p3 = scmp.ne.s32.totalorder %s667_s16, %s663_s15 }
   0xa   : > { %s858_s23 = smov (%p33_p0, %s31_s23), 0  ;;  %p161_p5 = scmp.eq.s32.totalorder %s439_s22, 1 }
   0xb   : > { %p755_p4 = por %p155_p2, %p154_p1  ;;  %s139_s26 = ssub.s32 %s679_s19, %s858_s23 }
   0xc   : > { %p440_p6 = scmp.ge.s32.totalorder %s683_s20, 1  ;;  %p142_p7 = scmp.eq.s32.totalorder %s139_s26, 0 }
   0xd   : > { %p762_p8 = por %p161_p5, %p160_p3  ;;  %p168_p9 = scmp.lt.s32.totalorder %s683_s20, 3 }
   0xe   : > { %s768_s28 = scalar_select %p142_p7, %s671_s17, %s144_s24  }
   0xf   : > { %p770_p10 = pnand %p440_p6, %p168_p9  ;;  %p774_p11 = scmp.eq.s32.totalorder %s438_s21, 0 }
  0x10   : > { %s181_s7 = sshll.u32 %s844_s1, 4  ;;  %s685_s8 = smov [#allocation2]   ;;  %s182_s7 = int_to_ptr.hbm [resolvable:$true] %s181_s7 }
  0x11   : > { %p465_p12 = pneg %p770_p10  ;;  %s183_s9 = sshll.u32 %s685_s8, 4  ;;  %s184_s9 = int_to_ptr.vmem [resolvable:$true] %s183_s9 }
  0x12   : > { %s198_s12 = sshll.u32 %s846_s3, 4  ;;  %s686_s13 = smov 128   ;;  %s199_s12 = int_to_ptr.hbm [resolvable:$true] %s198_s12 }
  0x13   : > { %p466_p13 = pnand %p774_p11, %p465_p12  ;;  %s687_s14 = smov 8  }
  0x14   : > { %s688_s21 = smov [#allocation5]   ;;  %227 = sbr.rel (%p770_p10) target bundleno = 180 (0xb4), region = 36 }
  0x15   : > { %468 = dma.hbm_to_vmem [thread:$0]  (!%p466_p13), %s182_s7, 512, %s184_s9, [#allocation3], %s686_s13, %s686_s13, %s687_s14  }
  0x16   : > { %s200_s22 = sshll.u32 %s688_s21, 4  ;;  %s201_s22 = int_to_ptr.vmem [resolvable:$true] %s200_s22 }
  0x17   : > { %471 = dma.hbm_to_vmem [thread:$0]  (!%p466_p13), %s199_s12, 32, %s201_s22, [#allocation6]  }
  0x19   : > { %650 = dma.done.wait (%p774_p11), [#allocation3], 512  }
  0x1a   : > { %652 = vsyncadd (%p774_p11), [#allocation3], 4294966784 }
  0x1b   : > { %654 = dma.done.wait (%p774_p11), [#allocation6], 32  }
  0x1c   : > { %656 = vsyncadd (%p774_p11), [#allocation6], 4294967264  ;;  %p262_p0 = scmp.lt.s32.totalorder %s675_s18, 1  ;;  %v689_v0 = vmov 0   ;;  %v274_v1 = vld [vmem:[#allocation2 + $0x18] sm:$0xff]  ;;  %v273_v2 = vld [vmem:[#allocation2 + $0x10] sm:$0xff] }
  0x1d   : > { %534 = vset.pattern.permute.xlu0 %v689_v0  ;;  %291 = vmatpush.msra.mxu0 %v274_v1  ;;  %v272_v4 = vld [vmem:[#allocation2 + $0x8] sm:$0xff]  ;;  %v271_v5 = vld [vmem:[#allocation2] sm:$0xff]  ;;  %vm275_vm0 = vcmask 261120   ;;  %s259_s9 = sand.u32 1, %s667_s16   ;;  %s452_s11 = sshll.u32 %s675_s18, 3 }
  0x1e   : > { %s263_s24 = scalar_select %p262_p0, %s675_s18, 1  ;;  %v299_v7 = vld [vmem:[#allocation5] sm:$0x3] }
  0x1f   : > { %292 = vmatpush.msra.mxu0 %v273_v2  ;;  %v306_v8 = vperm.slane %v299_v7, 0  ;;  %v309_v11 = vperm.slane %v299_v7, 1  ;;  %s447_s10 = sshll.u32 %s259_s9, 3  ;;  %s327_s14 = scalar_lea.hbm %s847_s4, %s452_s11 }
  0x20   : > { %s448_s26 = sshll.u32 %s263_s24, 3  ;;  %s261_s21 = scalar_lea.vmem [#allocation7], %s447_s10 }
  0x21   : > { %s269_s6 = scalar_lea.vmem %s845_s2, %s448_s26  ;;  %s265_s30 = scalar_lea.vmem %s843_s0, %s448_s26  ;;  %293 = vmatpush.msra.mxu0 %v272_v4 }
  0x22   : > { %v300_v3 = vld [vmem:[%s269_s6] sm:$0xff]  ;;  %s329_s22 = sshll.u32 %s261_s21, 4  ;;  %s331_s24 = sshll.u32 %s327_s14, 4  ;;  %s330_s22 = int_to_ptr.vmem [resolvable:$true] %s329_s22  ;;  %s332_s24 = int_to_ptr.hbm [resolvable:$true] %s331_s24 }
  0x23   : > { %303 = vperm.xlu0 %534, %v300_v3   ;;  %v270_v6 = vld [vmem:[%s265_s30] sm:$0xff]  ;;  %294 = vmatpush.msra.mxu0 %v271_v5  ;;  %s316_s26 = scalar_lea.sflag [#allocation4], %s259_s9  ;;  %s611_s29 = sshra.s32 %s332_s24, 4  ;;  %s612_s29 = int_to_ptr.hbm [resolvable:$true] %s611_s29 }
  0x24   : > { %450 = vmatmul.msk.f32.vlgmr.msra.gmra.mxu0 %vm275_vm0, %v270_v6  ;;  %s613_s5 = scalar_lea.hbm %s612_s29, 8  ;;  %s617_s7 = scalar_lea.hbm %s847_s4, 16 }
  0x25   : > { %p614_p1 = scmp.ne.s32.totalorder %s612_s29, %s613_s5  ;;  %p618_p5 = scmp.lt.s32.totalorder %s612_s29, %s847_s4 }
  0x26   : > { %p619_p6 = scmp.lt.s32.totalorder %s617_s7, %s613_s5 }
  0x27   : > { %p615_p2 = pnand %p614_p1, %p755_p4 }
  0x28   : > { %p620_p7 = por %p619_p6, %p618_p5 }
  0x29   : > { %p616_p3 = pneg %p615_p2 }
  0x2b   : > { %p621_p9 = pnand %p620_p7, %p616_p3 }
  0x95   : > { %v304_v9 = vpop.permute.xlu0 %303 }
  0x96   : > { %v307_v10 = vmul.f32 %v306_v8, %v304_v9 }
  0xa1   : > { %v296_v12 = vpop.f32.mrf.mxu0 }
  0xa2   : > { %v308_v13 = vsub.f32 %v296_v12, %v307_v10 }
  0xa4   : > { %v310_v14 = vsub.f32 %v308_v13, %v309_v11 }
  0xa6   : > { %v311_v15 = vmin.f32 %v310_v14, 0.0 }
  0xa8   : > { %v312_v16 = vmul.f32 1.442695, %v311_v15 }
  0xaa   : > { %535 = vpow2.f32 %v312_v16 }
  0xb0   : > { %v536_v17 = vpop.eup %535 }
  0xb1   : > { %314 = vst [vmem:[%s261_s21] sm:$0xff] %v536_v17 }
  0xb2   : > { %624 = shalt.err (!%p621_p9)
}
  0xb3   : > { %463 = dma.vmem_to_hbm [thread:$0]  (%p755_p4), %s330_s22, 128, %s332_s24, %s316_s26  }
  0xb4 PF: > { %p480_p10 = scmp.ge.s32.totalorder %s683_s20, 2  ;;  %s343_s9 = sand.u32 1, %s663_s15  }
  0xb5   : > { %s344_s10 = scalar_lea.sflag [#allocation4], %s343_s9 }
  0xb6   : > { %p473_p11 = pnand %p480_p10, %p762_p8 }
  0xb8   : > { %p474_p12 = pneg %p473_p11 }
  0xba   : > { %658 = dma.done.wait (%p474_p12), %s344_s10, 128  }
  0xbb   : > { %660 = vsyncadd (%p474_p12), %s344_s10, 4294967168  ;;  %s19_s20 = sadd.s32 1, %s683_s20   ;;  %s852_s15 = smov %s667_s16 }
  0xbc   : > { %p16_p13 = scmp.ge.s32.totalorder %s19_s20, 4   ;;  %s853_s16 = smov %s671_s17 }
  0xbd   : > { %s854_s17 = smov %s768_s28  ;;  %s855_s18 = smov %s679_s19 }
  0xbe   : > { %s856_s19 = smov %s858_s23  ;;  %18 = sbr.rel (!%p16_p13) target bundleno = 6 (0x6), region = 85 }
  0xc3   :  { %350 = vsyncpa [#allocation3], 1 }
  0xc4   :  { %352 = vsyncpa [#allocation3 + $0x1], 1 }
  0xc5   :  { %353 = vsyncpa [#allocation6], 1 }
  0xc6   :  { %354 = vsyncpa [#allocation4], 1 }
  0xc7   :  { %356 = vsyncpa [#allocation4 + $0x1], 1 }

</bundles_post_ra>
